<compile_context>
chip_gen: v5e
topology: v5e:2x2
jax: 0.10.0
libtpu: 0.0.40
codegen_flags: <defaults>
</compile_context>

<pallas_src>
import functools

import jax
import jax.numpy as jnp
from jax import lax
from jax.experimental import pallas as pl
from jax.experimental.pallas import tpu as pltpu


# --------------------------------------------------------------------------- #
# Kernel
# --------------------------------------------------------------------------- #
def _make_fp_kernel(num_layers: int, has_pfeat: bool):
    """Kernel for one (batch, N-tile) grid step."""

    def kernel(*refs):
        idx = 0
        pts_ref = refs[idx]; idx += 1        # (1, 3,  Tn)  f32
        cm2_ref = refs[idx]; idx += 1        # (1, M,  3)   f32  (-2 * centers^T)
        c2_ref = refs[idx]; idx += 1         # (1, M,  1)   f32  (|c|^2)
        cfeat_ref = refs[idx]; idx += 1      # (1, Cc, M)   bf16
        if has_pfeat:
            pfeat_ref = refs[idx]; idx += 1  # (1, Cp, Tn)  bf16
            w0b_ref = refs[idx]; idx += 1    # (C1, Cp)     bf16 (skip part of layer 0)
        w_refs, b_refs = [], []
        for _ in range(num_layers):
            w_refs.append(refs[idx]); idx += 1   # (Co, Ci)  bf16
            b_refs.append(refs[idx]); idx += 1   # (Co, 1)   f32
        out_ref = refs[idx]                  # (1, Cout, Tn) f32

        pts = pts_ref[0]                     # (3, Tn)
        cm2 = cm2_ref[0]                     # (M, 3)
        c2 = c2_ref[0]                       # (M, 1)
        M = cm2.shape[0]
        Tn = pts.shape[1]

        # ---- squared distances (minus the per-column |p|^2) on the MXU -------
        # dist2 = |c|^2 - 2 c.p + |p|^2 ; |p|^2 is constant per column so it
        # cannot change the per-column arg-min; it is re-added to the selected
        # minima below.  f32 operands + HIGHEST precision keep NN selection
        # stable for near-ties.
        dshift = jnp.dot(cm2, pts, preferred_element_type=jnp.float32,
                         precision=lax.Precision.HIGHEST) + c2        # (M, Tn)
        p2 = jnp.sum(pts * pts, axis=0, keepdims=True)                # (1, Tn)

        # ---- 3-NN inverse-(squared)-distance weights --------------------------
        # Exact first-occurrence tie-breaking (matches top_k / CUDA reference).
        BIG = jnp.float32(3.0e38)
        row_ids = lax.broadcasted_iota(jnp.int32, (M, Tn), 0).astype(jnp.float32)
        m_fill = jnp.float32(M)

        masked = dshift
        wmat = None                          # (M, Tn) unnormalized weights
        wsum = None                          # (1, Tn) weight sum
        for it in range(3):
            mk = jnp.min(masked, axis=0, keepdims=True)               # (1,Tn) XLU
            cand = jnp.where(masked <= mk, row_ids, m_fill)           # (M,Tn)
            first = jnp.min(cand, axis=0, keepdims=True)              # (1,Tn) XLU
            sel = row_ids == first                                    # exactly 1/row
            d_k = jnp.maximum(mk + p2, 0.0)                           # true dist2 >= 0
            rw = pl.reciprocal(d_k + jnp.float32(1e-8), approx=True)  # (1,Tn) EUP
            contrib = jnp.where(sel, rw, jnp.float32(0.0))
            wmat = contrib if it == 0 else wmat + contrib
            wsum = rw if it == 0 else wsum + rw
            if it < 2:                                                # skip last remask
                masked = jnp.where(sel, BIG, masked)

        inv_wsum = jnp.float32(1.0) / wsum    # exact normalization (cheap, (1,Tn))

        # ---- weighted interpolation on the MXU: (Cc, M) @ (M, Tn) ------------
        interp = jnp.dot(cfeat_ref[0], wmat.astype(jnp.bfloat16),
                         preferred_element_type=jnp.float32) * inv_wsum

        # ---- SharedMLP (1x1 conv + folded BN + ReLU). Layer 0 consumes the
        # skip features directly (concat eliminated by weight split). ----------
        feat = jnp.dot(w_refs[0][...], interp.astype(jnp.bfloat16),
                       preferred_element_type=jnp.float32)
        if has_pfeat:
            feat = feat + jnp.dot(w0b_ref[...], pfeat_ref[0],
                                  preferred_element_type=jnp.float32)
        feat = jnp.maximum(feat + b_refs[0][...], 0.0)

        for l in range(1, num_layers):
            feat = jnp.dot(w_refs[l][...], feat.astype(jnp.bfloat16),
                           preferred_element_type=jnp.float32)
            feat = jnp.maximum(feat + b_refs[l][...], 0.0)

        out_ref[0] = feat.astype(out_ref.dtype)

    return kernel


# --------------------------------------------------------------------------- #
# Wrapper helpers
# --------------------------------------------------------------------------- #
_VMEM_LIMIT = 48 * 1024 * 1024   # safe on v7x (64 MiB/TC) and v5e/v6e (128 MiB)


def _choose_tile_n(n: int, m_pad: int, cp: int, widths, vmem_limit_bytes: int) -> int:
    """VMEM-budget-driven lane-dense tile over the point axis."""
    c_max = max(widths)
    c_last = widths[-1]
    # Bytes per output lane (column of the tile):
    #   ~7 live (M, Tn)-sized f32/bf16 intermediates in the dist / 3-NN phase
    inter = 7 * m_pad * 4
    #   double-buffered streamed blocks: coords f32, skip features bf16, output f32
    stream = 2 * (3 * 4 + cp * 2 + c_last * 4)
    #   MLP live activations (widest layer, f32 + bf16 copy)
    act = 6 * c_max
    per_lane = inter + stream + act
    budget = vmem_limit_bytes - (8 << 20)     # resident centers/cfeat/weights + slack
    t = (budget // per_lane) // 128 * 128
    t = max(128, min(1024, t))
    t = min(t, ((n + 127) // 128) * 128)      # never bigger than (128-padded) N
    # Prefer a tile that divides N (skips the host-side pad copy) unless it
    # would more than double the number of grid steps.
    if n % 128 == 0 and n % t != 0:
        for cand in range(t - 128, max(128, t // 2) - 1, -128):
            if n % cand == 0:
                return cand
    return t


# --------------------------------------------------------------------------- #
# Wrapper
# --------------------------------------------------------------------------- #
def pointnet_fp_forward(points_coords, centers_coords, centers_features,
                        points_features, layer_params):
    """layer_params: list of (W_eff (Co,Ci) f32, b_eff (Co,) f32), BN folded."""
    B, _, N = points_coords.shape
    M = centers_coords.shape[2]
    Cc = centers_features.shape[1]
    assert M >= 3, "3-NN interpolation requires at least 3 centers"
    has_pfeat = points_features is not None
    Cp = points_features.shape[1] if has_pfeat else 0
    num_layers = len(layer_params)
    widths = [w.shape[0] for (w, _) in layer_params]
    c_out_last = widths[-1]

    # --- pad M to a sublane multiple with far-away sentinel centers -----------
    # (sentinels have huge distance so they are never selected, zero features)
    M_pad = ((M + 7) // 8) * 8
    if M_pad != M:
        pad_c = jnp.full((B, 3, M_pad - M), 1.0e6, points_coords.dtype)
        centers_coords_p = jnp.concatenate([centers_coords, pad_c], axis=2)
        pad_f = jnp.zeros((B, Cc, M_pad - M), centers_features.dtype)
        centers_features_p = jnp.concatenate([centers_features, pad_f], axis=2)
    else:
        centers_coords_p = centers_coords
        centers_features_p = centers_features

    # --- lane-dense, VMEM-budget-driven tiling over N --------------------------
    TILE_N = _choose_tile_n(N, M_pad, Cp, widths, _VMEM_LIMIT)
    n_tiles = pl.cdiv(N, TILE_N)
    N_pad = n_tiles * TILE_N
    if N_pad != N:
        pad = [(0, 0), (0, 0), (0, N_pad - N)]
        points_coords_p = jnp.pad(points_coords, pad)
        points_features_p = jnp.pad(points_features, pad) if has_pfeat else None
    else:
        points_coords_p = points_coords
        points_features_p = points_features

    # --- host-side prep: MXU distance operands, bf16 weights, split layer 0 ----
    ct = jnp.transpose(centers_coords_p, (0, 2, 1)).astype(jnp.float32)  # (B,M,3)
    cm2 = ct * jnp.float32(-2.0)                                         # (B,M,3)
    c2 = jnp.sum(ct * ct, axis=-1, keepdims=True)                        # (B,M,1)
    centers_features_bf = centers_features_p.astype(jnp.bfloat16)

    w_list = [w for (w, _) in layer_params]
    b_list = [b.reshape(-1, 1).astype(jnp.float32) for (_, b) in layer_params]
    if has_pfeat:
        w0a = w_list[0][:, :Cc].astype(jnp.bfloat16)                     # interp part
        w0b = w_list[0][:, Cc:].astype(jnp.bfloat16)                     # skip part
    else:
        w0a = w_list[0].astype(jnp.bfloat16)
        w0b = None
    rest_w = [w.astype(jnp.bfloat16) for w in w_list[1:]]

    inputs = [points_coords_p, cm2, c2, centers_features_bf]
    in_specs = [
        pl.BlockSpec((1, 3, TILE_N), lambda b, n: (b, 0, n)),
        pl.BlockSpec((1, M_pad, 3), lambda b, n: (b, 0, 0)),      # resident over n
        pl.BlockSpec((1, M_pad, 1), lambda b, n: (b, 0, 0)),      # resident over n
        pl.BlockSpec((1, Cc, M_pad), lambda b, n: (b, 0, 0)),     # resident over n
    ]
    if has_pfeat:
        inputs.append(points_features_p.astype(jnp.bfloat16))
        in_specs.append(pl.BlockSpec((1, Cp, TILE_N), lambda b, n: (b, 0, n)))
        inputs.append(w0b)
        in_specs.append(pl.BlockSpec(w0b.shape, lambda b, n: (0, 0)))
    for w, bias in zip([w0a] + rest_w, b_list):
        inputs.append(w)
        in_specs.append(pl.BlockSpec(w.shape, lambda b, n: (0, 0)))
        inputs.append(bias)
        in_specs.append(pl.BlockSpec(bias.shape, lambda b, n: (0, 0)))

    kernel = _make_fp_kernel(num_layers, has_pfeat)

    out = pl.pallas_call(
        kernel,
        out_shape=jax.ShapeDtypeStruct((B, c_out_last, N_pad), jnp.float32),
        grid_spec=pltpu.PrefetchScalarGridSpec(
            num_scalar_prefetch=0,
            grid=(B, n_tiles),
            in_specs=in_specs,
            out_specs=pl.BlockSpec((1, c_out_last, TILE_N),
                                   lambda b, n: (b, 0, n)),
        ),
        compiler_params=pltpu.CompilerParams(
            dimension_semantics=("parallel", "parallel"),
            vmem_limit_bytes=_VMEM_LIMIT,
        ),
    )(*inputs)

    if N_pad != N:
        out = out[:, :, :N]
    # Module returns (mlp(interpolated_features), points_coords)
    return out, points_coords


# --------------------------------------------------------------------------- #
# Params & pure-JAX reference
# --------------------------------------------------------------------------- #
def init_shared_mlp_params(key, in_channels, out_channels_list):
    """Deterministic Conv1d(k=1)+BN(eval, fresh init) params, BN folded in."""
    params = []
    c_in = in_channels
    eps = 1e-5
    bn_scale = 1.0 / jnp.sqrt(1.0 + eps)   # gamma=1, beta=0, mean=0, var=1
    for c_out in out_channels_list:
        key, kw, kb = jax.random.split(key, 3)
        w = jax.random.normal(kw, (c_out, c_in), jnp.float32) * 0.1
        b = jax.random.normal(kb, (c_out,), jnp.float32) * 0.1
        params.append((w * bn_scale, b * bn_scale))
        c_in = c_out
    return params


def pointnet_fp_reference(points_coords, centers_coords, centers_features,
                          points_features, layer_params):
    """f32 reference of the module forward (3-NN inverse-dist^2 interpolation)."""
    diff = centers_coords[:, :, :, None] - points_coords[:, :, None, :]  # (B,3,M,N)
    dist2 = jnp.sum(diff * diff, axis=1)                                 # (B,M,N)

    def interp_one(cf, d2):                      # cf (Cc,M), d2 (M,N)
        neg, idx = lax.top_k(-d2.T, 3)           # (N,3)
        d3 = -neg
        w = 1.0 / (d3 + 1e-8)
        w = w / jnp.sum(w, axis=-1, keepdims=True)
        g = cf[:, idx]                           # (Cc,N,3)
        return jnp.sum(g * w[None], axis=-1)     # (Cc,N)

    interp = jax.vmap(interp_one)(centers_features, dist2)
    feat = interp if points_features is None else jnp.concatenate(
        [interp, points_features], axis=1)
    for (W, b) in layer_params:
        feat = jnp.einsum('oi,bin->bon', W, feat) + b[None, :, None]
        feat = jnp.maximum(feat, 0.0)
    return feat, points_coords


# --------------------------------------------------------------------------- #
# Main
# --------------------------------------------------------------------------- #
if __name__ == "__main__":
    key = jax.random.PRNGKey(0)
    B, N, M = 2, 64, 16          # batch, dense points, sparse centers
    Cc, Cp = 8, 4                # center feature channels, skip feature channels
    in_channels = Cc + Cp
    out_channels = [16, 32]      # SharedMLP layer widths

    k1, k2, k3, k4, kp = jax.random.split(key, 5)
    points_coords = jax.random.normal(k1, (B, 3, N), jnp.float32)
    centers_coords = jax.random.normal(k2, (B, 3, M), jnp.float32)
    centers_features = jax.random.normal(k3, (B, Cc, M), jnp.float32)
    points_features = jax.random.normal(k4, (B, Cp, N), jnp.float32)

    layer_params = init_shared_mlp_params(kp, in_channels, out_channels)

    fwd = jax.jit(functools.partial(pointnet_fp_forward,
                                    layer_params=layer_params))
    mlp_out, pts_out = fwd(points_coords, centers_coords,
                           centers_features, points_features)
    jax.block_until_ready(mlp_out)
    jax.block_until_ready(pts_out)

    assert mlp_out.shape == (B, out_channels[-1], N)
    assert pts_out.shape == (B, 3, N)

    # Loose-tolerance sanity check against a pure-f32 JAX reference (the kernel
    # uses bf16 MXU operands + approx per-neighbor reciprocals by design).
    ref_out, _ = pointnet_fp_reference(points_coords, centers_coords,
                                       centers_features, points_features,
                                       layer_params)
    max_err = float(jnp.max(jnp.abs(mlp_out - ref_out)))
    assert max_err < 0.15, f"max abs error too large: {max_err}"

    print("KERNEL_OK")
</pallas_src>

<mosaic_0001>
module attributes {stable_mosaic.version = 11 : i64} {
  func.func @kernel(%arg0: i32, %arg1: i32, %arg2: memref<1x3x128xf32, #tpu.memory_space<vmem>>, %arg3: memref<1x16x3xf32, #tpu.memory_space<vmem>>, %arg4: memref<1x16x1xf32, #tpu.memory_space<vmem>>, %arg5: memref<1x8x16xbf16, #tpu.memory_space<vmem>>, %arg6: memref<1x4x128xbf16, #tpu.memory_space<vmem>>, %arg7: memref<16x4xbf16, #tpu.memory_space<vmem>>, %arg8: memref<16x8xbf16, #tpu.memory_space<vmem>>, %arg9: memref<16x1xf32, #tpu.memory_space<vmem>>, %arg10: memref<32x16xbf16, #tpu.memory_space<vmem>>, %arg11: memref<32x1xf32, #tpu.memory_space<vmem>>, %arg12: memref<1x32x128xf32, #tpu.memory_space<vmem>>) attributes {dimension_semantics = [#tpu.dimension_semantics<parallel>, #tpu.dimension_semantics<parallel>], iteration_bounds = array<i64: 2, 1>, scalar_prefetch = 0 : i64, scratch_operands = 0 : i64, tpu.core_type = #tpu.core_type<tc>, window_params = [{transform_indices = @transform_0, window_bounds = array<i64: 1, 3, 128>}, {transform_indices = @transform_1, window_bounds = array<i64: 1, 16, 3>}, {transform_indices = @transform_2, window_bounds = array<i64: 1, 16, 1>}, {transform_indices = @transform_3, window_bounds = array<i64: 1, 8, 16>}, {transform_indices = @transform_4, window_bounds = array<i64: 1, 4, 128>}, {pipeline_mode = #tpu.pipeline_mode<synchronous>, transform_indices = @transform_5, window_bounds = array<i64: 16, 4>}, {pipeline_mode = #tpu.pipeline_mode<synchronous>, transform_indices = @transform_6, window_bounds = array<i64: 16, 8>}, {pipeline_mode = #tpu.pipeline_mode<synchronous>, transform_indices = @transform_7, window_bounds = array<i64: 16, 1>}, {pipeline_mode = #tpu.pipeline_mode<synchronous>, transform_indices = @transform_8, window_bounds = array<i64: 32, 16>}, {pipeline_mode = #tpu.pipeline_mode<synchronous>, transform_indices = @transform_9, window_bounds = array<i64: 32, 1>}, {transform_indices = @transform_10, window_bounds = array<i64: 1, 32, 128>}]} {
    %c0 = arith.constant 0 : index
    %c0_0 = arith.constant 0 : index
    %c0_1 = arith.constant 0 : index
    %0 = vector.load %arg2[%c0, %c0_0, %c0_1] : memref<1x3x128xf32, #tpu.memory_space<vmem>>, vector<1x3x128xf32>
    %1 = vector.shape_cast %0 : vector<1x3x128xf32> to vector<3x128xf32>
    %c0_2 = arith.constant 0 : index
    %c0_3 = arith.constant 0 : index
    %c0_4 = arith.constant 0 : index
    %2 = vector.load %arg3[%c0_2, %c0_3, %c0_4] : memref<1x16x3xf32, #tpu.memory_space<vmem>>, vector<1x16x3xf32>
    %3 = vector.shape_cast %2 : vector<1x16x3xf32> to vector<16x3xf32>
    %c0_5 = arith.constant 0 : index
    %c0_6 = arith.constant 0 : index
    %c0_7 = arith.constant 0 : index
    %4 = vector.load %arg4[%c0_5, %c0_6, %c0_7] : memref<1x16x1xf32, #tpu.memory_space<vmem>>, vector<1x16x1xf32>
    %5 = vector.shape_cast %4 : vector<1x16x1xf32> to vector<16x1xf32>
    %cst = arith.constant dense<0.000000e+00> : vector<16x128xf32>
    %6 = tpu.matmul %3, %1, %cst {dimension_numbers = #tpu.dot_dimension_numbers<[1], [0], [0], [1], [0, 0, 1, 1], [], []>, precision = #tpu.contract_precision<fp32>} : vector<16x3xf32>, vector<3x128xf32>, vector<16x128xf32> -> vector<16x128xf32>
    %7 = vector.broadcast %5 : vector<16x1xf32> to vector<16x128xf32>
    %8 = arith.addf %6, %7 : vector<16x128xf32>
    %9 = arith.mulf %1, %1 : vector<3x128xf32>
    %cst_8 = arith.constant dense<0.000000e+00> : vector<128xf32>
    %10 = vector.multi_reduction <add>, %9, %cst_8 [0] : vector<3x128xf32> to vector<128xf32>
    %11 = vector.shape_cast %10 : vector<128xf32> to vector<1x128xf32>
    %12 = tpu.iota {dimensions = array<i32: 0>} : vector<16x128xi32>
    %13 = arith.sitofp %12 : vector<16x128xi32> to vector<16x128xf32>
    %cst_9 = arith.constant dense<0x7F800000> : vector<128xf32>
    %14 = vector.multi_reduction <minimumf>, %8, %cst_9 [0] : vector<16x128xf32> to vector<128xf32>
    %15 = vector.shape_cast %14 : vector<128xf32> to vector<1x128xf32>
    %16 = vector.broadcast %15 : vector<1x128xf32> to vector<16x128xf32>
    %17 = arith.cmpf ole, %8, %16 : vector<16x128xf32>
    %cst_10 = arith.constant 1.600000e+01 : f32
    %18 = vector.broadcast %cst_10 : f32 to vector<16x128xf32>
    %19 = arith.select %17, %13, %18 : vector<16x128xi1>, vector<16x128xf32>
    %cst_11 = arith.constant dense<0x7F800000> : vector<128xf32>
    %20 = vector.multi_reduction <minimumf>, %19, %cst_11 [0] : vector<16x128xf32> to vector<128xf32>
    %21 = vector.shape_cast %20 : vector<128xf32> to vector<1x128xf32>
    %22 = vector.broadcast %21 : vector<1x128xf32> to vector<16x128xf32>
    %23 = arith.cmpf oeq, %13, %22 : vector<16x128xf32>
    %24 = arith.addf %15, %11 : vector<1x128xf32>
    %cst_12 = arith.constant 0.000000e+00 : f32
    %25 = vector.broadcast %cst_12 : f32 to vector<1x128xf32>
    %26 = arith.maximumf %24, %25 : vector<1x128xf32>
    %cst_13 = arith.constant 9.99999993E-9 : f32
    %27 = vector.broadcast %cst_13 : f32 to vector<1x128xf32>
    %28 = arith.addf %26, %27 : vector<1x128xf32>
    %29 = tpu.reciprocal %28 {approx = true} : vector<1x128xf32> -> vector<1x128xf32>
    %cst_14 = arith.constant 0.000000e+00 : f32
    %30 = vector.shape_cast %29 : vector<1x128xf32> to vector<1x128xf32>
    %31 = vector.broadcast %30 : vector<1x128xf32> to vector<16x128xf32>
    %32 = vector.broadcast %cst_14 : f32 to vector<16x128xf32>
    %33 = arith.select %23, %31, %32 : vector<16x128xi1>, vector<16x128xf32>
    %cst_15 = arith.constant 3.000000e+38 : f32
    %34 = vector.broadcast %cst_15 : f32 to vector<16x128xf32>
    %35 = arith.select %23, %34, %8 : vector<16x128xi1>, vector<16x128xf32>
    %cst_16 = arith.constant dense<0x7F800000> : vector<128xf32>
    %36 = vector.multi_reduction <minimumf>, %35, %cst_16 [0] : vector<16x128xf32> to vector<128xf32>
    %37 = vector.shape_cast %36 : vector<128xf32> to vector<1x128xf32>
    %38 = vector.broadcast %37 : vector<1x128xf32> to vector<16x128xf32>
    %39 = arith.cmpf ole, %35, %38 : vector<16x128xf32>
    %cst_17 = arith.constant 1.600000e+01 : f32
    %40 = vector.broadcast %cst_17 : f32 to vector<16x128xf32>
    %41 = arith.select %39, %13, %40 : vector<16x128xi1>, vector<16x128xf32>
    %cst_18 = arith.constant dense<0x7F800000> : vector<128xf32>
    %42 = vector.multi_reduction <minimumf>, %41, %cst_18 [0] : vector<16x128xf32> to vector<128xf32>
    %43 = vector.shape_cast %42 : vector<128xf32> to vector<1x128xf32>
    %44 = vector.broadcast %43 : vector<1x128xf32> to vector<16x128xf32>
    %45 = arith.cmpf oeq, %13, %44 : vector<16x128xf32>
    %46 = arith.addf %37, %11 : vector<1x128xf32>
    %cst_19 = arith.constant 0.000000e+00 : f32
    %47 = vector.broadcast %cst_19 : f32 to vector<1x128xf32>
    %48 = arith.maximumf %46, %47 : vector<1x128xf32>
    %cst_20 = arith.constant 9.99999993E-9 : f32
    %49 = vector.broadcast %cst_20 : f32 to vector<1x128xf32>
    %50 = arith.addf %48, %49 : vector<1x128xf32>
    %51 = tpu.reciprocal %50 {approx = true} : vector<1x128xf32> -> vector<1x128xf32>
    %cst_21 = arith.constant 0.000000e+00 : f32
    %52 = vector.shape_cast %51 : vector<1x128xf32> to vector<1x128xf32>
    %53 = vector.broadcast %52 : vector<1x128xf32> to vector<16x128xf32>
    %54 = vector.broadcast %cst_21 : f32 to vector<16x128xf32>
    %55 = arith.select %45, %53, %54 : vector<16x128xi1>, vector<16x128xf32>
    %56 = arith.addf %33, %55 : vector<16x128xf32>
    %57 = arith.addf %29, %51 : vector<1x128xf32>
    %cst_22 = arith.constant 3.000000e+38 : f32
    %58 = vector.broadcast %cst_22 : f32 to vector<16x128xf32>
    %59 = arith.select %45, %58, %35 : vector<16x128xi1>, vector<16x128xf32>
    %cst_23 = arith.constant dense<0x7F800000> : vector<128xf32>
    %60 = vector.multi_reduction <minimumf>, %59, %cst_23 [0] : vector<16x128xf32> to vector<128xf32>
    %61 = vector.shape_cast %60 : vector<128xf32> to vector<1x128xf32>
    %62 = vector.broadcast %61 : vector<1x128xf32> to vector<16x128xf32>
    %63 = arith.cmpf ole, %59, %62 : vector<16x128xf32>
    %cst_24 = arith.constant 1.600000e+01 : f32
    %64 = vector.broadcast %cst_24 : f32 to vector<16x128xf32>
    %65 = arith.select %63, %13, %64 : vector<16x128xi1>, vector<16x128xf32>
    %cst_25 = arith.constant dense<0x7F800000> : vector<128xf32>
    %66 = vector.multi_reduction <minimumf>, %65, %cst_25 [0] : vector<16x128xf32> to vector<128xf32>
    %67 = vector.shape_cast %66 : vector<128xf32> to vector<1x128xf32>
    %68 = vector.broadcast %67 : vector<1x128xf32> to vector<16x128xf32>
    %69 = arith.cmpf oeq, %13, %68 : vector<16x128xf32>
    %70 = arith.addf %61, %11 : vector<1x128xf32>
    %cst_26 = arith.constant 0.000000e+00 : f32
    %71 = vector.broadcast %cst_26 : f32 to vector<1x128xf32>
    %72 = arith.maximumf %70, %71 : vector<1x128xf32>
    %cst_27 = arith.constant 9.99999993E-9 : f32
    %73 = vector.broadcast %cst_27 : f32 to vector<1x128xf32>
    %74 = arith.addf %72, %73 : vector<1x128xf32>
    %75 = tpu.reciprocal %74 {approx = true} : vector<1x128xf32> -> vector<1x128xf32>
    %cst_28 = arith.constant 0.000000e+00 : f32
    %76 = vector.shape_cast %75 : vector<1x128xf32> to vector<1x128xf32>
    %77 = vector.broadcast %76 : vector<1x128xf32> to vector<16x128xf32>
    %78 = vector.broadcast %cst_28 : f32 to vector<16x128xf32>
    %79 = arith.select %69, %77, %78 : vector<16x128xi1>, vector<16x128xf32>
    %80 = arith.addf %56, %79 : vector<16x128xf32>
    %81 = arith.addf %57, %75 : vector<1x128xf32>
    %cst_29 = arith.constant 1.000000e+00 : f32
    %82 = vector.broadcast %cst_29 : f32 to vector<1x128xf32>
    %83 = arith.divf %82, %81 : vector<1x128xf32>
    %c0_30 = arith.constant 0 : index
    %c0_31 = arith.constant 0 : index
    %c0_32 = arith.constant 0 : index
    %84 = vector.load %arg5[%c0_30, %c0_31, %c0_32] : memref<1x8x16xbf16, #tpu.memory_space<vmem>>, vector<1x8x16xbf16>
    %85 = vector.shape_cast %84 : vector<1x8x16xbf16> to vector<8x16xbf16>
    %86 = arith.truncf %80 : vector<16x128xf32> to vector<16x128xbf16>
    %cst_33 = arith.constant dense<0.000000e+00> : vector<8x128xf32>
    %87 = tpu.matmul %85, %86, %cst_33 {dimension_numbers = #tpu.dot_dimension_numbers<[1], [0], [0], [1], [0, 0, 1, 1], [], []>} : vector<8x16xbf16>, vector<16x128xbf16>, vector<8x128xf32> -> vector<8x128xf32>
    %88 = vector.broadcast %83 : vector<1x128xf32> to vector<8x128xf32>
    %89 = arith.mulf %87, %88 : vector<8x128xf32>
    %c0_34 = arith.constant 0 : index
    %c0_35 = arith.constant 0 : index
    %90 = vector.load %arg8[%c0_34, %c0_35] : memref<16x8xbf16, #tpu.memory_space<vmem>>, vector<16x8xbf16>
    %91 = arith.truncf %89 : vector<8x128xf32> to vector<8x128xbf16>
    %cst_36 = arith.constant dense<0.000000e+00> : vector<16x128xf32>
    %92 = tpu.matmul %90, %91, %cst_36 {dimension_numbers = #tpu.dot_dimension_numbers<[1], [0], [0], [1], [0, 0, 1, 1], [], []>} : vector<16x8xbf16>, vector<8x128xbf16>, vector<16x128xf32> -> vector<16x128xf32>
    %c0_37 = arith.constant 0 : index
    %c0_38 = arith.constant 0 : index
    %93 = vector.load %arg7[%c0_37, %c0_38] : memref<16x4xbf16, #tpu.memory_space<vmem>>, vector<16x4xbf16>
    %c0_39 = arith.constant 0 : index
    %c0_40 = arith.constant 0 : index
    %c0_41 = arith.constant 0 : index
    %94 = vector.load %arg6[%c0_39, %c0_40, %c0_41] : memref<1x4x128xbf16, #tpu.memory_space<vmem>>, vector<1x4x128xbf16>
    %95 = vector.shape_cast %94 : vector<1x4x128xbf16> to vector<4x128xbf16>
    %cst_42 = arith.constant dense<0.000000e+00> : vector<16x128xf32>
    %96 = tpu.matmul %93, %95, %cst_42 {dimension_numbers = #tpu.dot_dimension_numbers<[1], [0], [0], [1], [0, 0, 1, 1], [], []>} : vector<16x4xbf16>, vector<4x128xbf16>, vector<16x128xf32> -> vector<16x128xf32>
    %97 = arith.addf %92, %96 : vector<16x128xf32>
    %c0_43 = arith.constant 0 : index
    %c0_44 = arith.constant 0 : index
    %98 = vector.load %arg9[%c0_43, %c0_44] : memref<16x1xf32, #tpu.memory_space<vmem>>, vector<16x1xf32>
    %99 = vector.broadcast %98 : vector<16x1xf32> to vector<16x128xf32>
    %100 = arith.addf %97, %99 : vector<16x128xf32>
    %cst_45 = arith.constant 0.000000e+00 : f32
    %101 = vector.broadcast %cst_45 : f32 to vector<16x128xf32>
    %102 = arith.maximumf %100, %101 : vector<16x128xf32>
    %c0_46 = arith.constant 0 : index
    %c0_47 = arith.constant 0 : index
    %103 = vector.load %arg10[%c0_46, %c0_47] : memref<32x16xbf16, #tpu.memory_space<vmem>>, vector<32x16xbf16>
    %104 = arith.truncf %102 : vector<16x128xf32> to vector<16x128xbf16>
    %cst_48 = arith.constant dense<0.000000e+00> : vector<32x128xf32>
    %105 = tpu.matmul %103, %104, %cst_48 {dimension_numbers = #tpu.dot_dimension_numbers<[1], [0], [0], [1], [0, 0, 1, 1], [], []>} : vector<32x16xbf16>, vector<16x128xbf16>, vector<32x128xf32> -> vector<32x128xf32>
    %c0_49 = arith.constant 0 : index
    %c0_50 = arith.constant 0 : index
    %106 = vector.load %arg11[%c0_49, %c0_50] : memref<32x1xf32, #tpu.memory_space<vmem>>, vector<32x1xf32>
    %107 = vector.broadcast %106 : vector<32x1xf32> to vector<32x128xf32>
    %108 = arith.addf %105, %107 : vector<32x128xf32>
    %cst_51 = arith.constant 0.000000e+00 : f32
    %109 = vector.broadcast %cst_51 : f32 to vector<32x128xf32>
    %110 = arith.maximumf %108, %109 : vector<32x128xf32>
    %c0_52 = arith.constant 0 : index
    %c0_53 = arith.constant 0 : index
    %c0_54 = arith.constant 0 : index
    %111 = vector.load %arg12[%c0_52, %c0_53, %c0_54] : memref<1x32x128xf32, #tpu.memory_space<vmem>>, vector<1x32x128xf32>
    %112 = vector.shape_cast %111 : vector<1x32x128xf32> to vector<32x128xf32>
    %113 = vector.shape_cast %110 : vector<32x128xf32> to vector<1x32x128xf32>
    tpu.vector_store %arg12[%c0_52, %c0_53, %c0_54], %113 {strides = array<i32>} : memref<1x32x128xf32, #tpu.memory_space<vmem>>, vector<1x32x128xf32>,
    return
  }
  func.func @transform_0(%arg0: i32, %arg1: i32) -> (i32, i32, i32) {
    %c0_i32 = arith.constant 0 : i32
    %c0_i32_0 = arith.constant 0 : i32
    return %arg0, %c0_i32, %arg1 : i32, i32, i32
  }
  func.func @transform_1(%arg0: i32, %arg1: i32) -> (i32, i32, i32) {
    %c0_i32 = arith.constant 0 : i32
    %c0_i32_0 = arith.constant 0 : i32
    %c0_i32_1 = arith.constant 0 : i32
    return %arg0, %c0_i32, %c0_i32_0 : i32, i32, i32
  }
  func.func @transform_2(%arg0: i32, %arg1: i32) -> (i32, i32, i32) {
    %c0_i32 = arith.constant 0 : i32
    %c0_i32_0 = arith.constant 0 : i32
    %c0_i32_1 = arith.constant 0 : i32
    return %arg0, %c0_i32, %c0_i32_0 : i32, i32, i32
  }
  func.func @transform_3(%arg0: i32, %arg1: i32) -> (i32, i32, i32) {
    %c0_i32 = arith.constant 0 : i32
    %c0_i32_0 = arith.constant 0 : i32
    %c0_i32_1 = arith.constant 0 : i32
    return %arg0, %c0_i32, %c0_i32_0 : i32, i32, i32
  }
  func.func @transform_4(%arg0: i32, %arg1: i32) -> (i32, i32, i32) {
    %c0_i32 = arith.constant 0 : i32
    %c0_i32_0 = arith.constant 0 : i32
    return %arg0, %c0_i32, %arg1 : i32, i32, i32
  }
  func.func @transform_5(%arg0: i32, %arg1: i32) -> (i32, i32) {
    %c0_i32 = arith.constant 0 : i32
    %c0_i32_0 = arith.constant 0 : i32
    %c0_i32_1 = arith.constant 0 : i32
    return %c0_i32, %c0_i32_0 : i32, i32
  }
  func.func @transform_6(%arg0: i32, %arg1: i32) -> (i32, i32) {
    %c0_i32 = arith.constant 0 : i32
    %c0_i32_0 = arith.constant 0 : i32
    %c0_i32_1 = arith.constant 0 : i32
    return %c0_i32, %c0_i32_0 : i32, i32
  }
  func.func @transform_7(%arg0: i32, %arg1: i32) -> (i32, i32) {
    %c0_i32 = arith.constant 0 : i32
    %c0_i32_0 = arith.constant 0 : i32
    %c0_i32_1 = arith.constant 0 : i32
    return %c0_i32, %c0_i32_0 : i32, i32
  }
  func.func @transform_8(%arg0: i32, %arg1: i32) -> (i32, i32) {
    %c0_i32 = arith.constant 0 : i32
    %c0_i32_0 = arith.constant 0 : i32
    %c0_i32_1 = arith.constant 0 : i32
    return %c0_i32, %c0_i32_0 : i32, i32
  }
  func.func @transform_9(%arg0: i32, %arg1: i32) -> (i32, i32) {
    %c0_i32 = arith.constant 0 : i32
    %c0_i32_0 = arith.constant 0 : i32
    %c0_i32_1 = arith.constant 0 : i32
    return %c0_i32, %c0_i32_0 : i32, i32
  }
  func.func @transform_10(%arg0: i32, %arg1: i32) -> (i32, i32, i32) {
    %c0_i32 = arith.constant 0 : i32
    %c0_i32_0 = arith.constant 0 : i32
    return %arg0, %c0_i32, %arg1 : i32, i32, i32
  }
}

</mosaic_0001>

<bundles_post_ra>
// kernel: pointnet_fp_forward.1
= control target key start
LH: loop header
LB: loop body
LE: loop exit
PB: predicated region body
PF: predicated region fallthrough
CT: control target
= control target key end

     0   :  { %15 = vsyncpa [#allocation3], 0  ;;  %s1532_s0 = inlined_call_operand.vmem [shape: f32[2,3,128], index: 0, kind: input, shape index: {}]   ;;  %s1533_s1 = inlined_call_operand.vmem [shape: f32[2,16,3], index: 1, kind: input, shape index: {}]   ;;  %s1534_s2 = inlined_call_operand.vmem [shape: f32[2,16,1], index: 2, kind: input, shape index: {}]   ;;  %s1535_s3 = inlined_call_operand.vmem [shape: bf16[2,8,16], index: 3, kind: input, shape index: {}]   ;;  %s1536_s4 = inlined_call_operand.vmem [shape: bf16[2,4,128], index: 4, kind: input, shape index: {}]   ;;  %s1537_s5 = inlined_call_operand.vmem [shape: bf16[16,4], index: 5, kind: input, shape index: {}]   ;;  %s1538_s6 = inlined_call_operand.vmem [shape: bf16[16,8], index: 6, kind: input, shape index: {}]   ;;  %s1539_s7 = inlined_call_operand.vmem [shape: f32[16,1], index: 7, kind: input, shape index: {}]   ;;  %s1540_s8 = inlined_call_operand.vmem [shape: bf16[32,16], index: 8, kind: input, shape index: {}]   ;;  %s1541_s9 = inlined_call_operand.vmem [shape: f32[32,1], index: 9, kind: input, shape index: {}]   ;;  %s1542_s10 = inlined_call_operand.hbm [shape: f32[2,32,128], index: 10, kind: output, shape index: {}]  }
   0x1   :  { %17 = vsyncpa [#allocation3 + $0x1], 0  ;;  %s1350_s13 = smov 0   ;;  %s1352_s14 = smov 0  }
   0x2   :  { %s1354_s15 = smov 0   ;;  %s1356_s16 = smov 0  }
   0x3   :  { %s1358_s17 = smov 0   ;;  %s1360_s18 = smov 0  }
   0x4 LB: > { %1545 = sst [smem:[#allocation5_spill]] %s1286_s17  ;;  %s1096_s19 = sadd.s32 4294967295, %s1290_s18   ;;  %s1290_s18 = sphi %s1360_s18, %s23_s18   ;;  %s1286_s17 = sphi %s1358_s17, %s1550_s17   ;;  %s1282_s16 = sphi %s1356_s16, %s1549_s16   ;;  %s1278_s15 = sphi %s1354_s15, %s1553_s15   ;;  %s1274_s14 = sphi %s1352_s14, %s1552_s14   ;;  %s1270_s13 = sphi %s1350_s13, %s1551_s13  }
   0x5   : > { %s1097_s20 = sadd.s32 4294967294, %s1290_s18   ;;  %s35_s21 = sadd.s32 1, %s1286_s17 }
   0x6   : > { %s283_s22 = sadd.s32 1, %s1278_s15  ;;  %p37_p0 = scmp.ge.s32.totalorder %s35_s21, 2 }
   0x7   : > { %p293_p1 = scmp.ne.s32.totalorder %s1278_s15, %s1274_s14  ;;  %p294_p2 = scmp.eq.s32.totalorder %s1096_s19, 1 }
   0x8   : > { %p299_p3 = scmp.ne.s32.totalorder %s1274_s14, %s1270_s13  ;;  %s1555_s21 = smov (%p37_p0, %s35_s21), 0 }
   0x9   : > { %1546 = sst [smem:[#allocation6_spill]] %s1555_s21  ;;  %p1390_p4 = por %p294_p2, %p293_p1 }
   0xa   : > { %p300_p5 = scmp.eq.s32.totalorder %s1097_s20, 1  ;;  %s278_s24 = ssub.s32 %s1286_s17, %s1555_s21 }
   0xb   : > { %p1100_p6 = scmp.ge.s32.totalorder %s1290_s18, 1  ;;  %p281_p7 = scmp.eq.s32.totalorder %s278_s24, 0 }
   0xc   : > { %p1397_p8 = por %p300_p5, %p299_p3  ;;  %p376_p9 = scmp.lt.s32.totalorder %s1290_s18, 3 }
   0xd   : > { %s1403_s26 = scalar_select %p281_p7, %s1278_s15, %s283_s22  }
   0xe   : > { %p377_p10 = pnand %p1100_p6, %p376_p9 }
   0xf   : > { %p437_p11 = scmp.lt.s32.totalorder (!%p377_p10), %s1282_s16, 1  ;;  %s1141_s19 = sshll.u32 (!%p377_p10), %s1282_s16, 5 }
  0x10   : > { %380 = sbr.rel (%p377_p10) target bundleno = 748 (0x2ec), region = 60  ;;  %s966_s24 = scalar_lea.hbm (!%p377_p10), %s1542_s10, %s1141_s19 }
  0x11   : > { %s1232_s19 = scalar_lea.hbm (!%p377_p10), %s1542_s10, 64 }
  0x15   : > { %v1292_v0 = vmov 0   ;;  %s1407_s27 = scalar_select %p437_p11, %s1282_s16, 1  ;;  %vm488_vm0 = vcmask 1042432   ;;  %vm481_vm1 = vcmask 23552   ;;  %v888_v26 = vld [vmem:[%s1541_s9 + $0x10] sm:$0xff]  ;;  %v677_v56 = vlaneseq }
  0x16   : > { %1201 = vset.pattern.permute.xlu0 %v1292_v0  ;;  %1202 = vset.pattern.permute.xlu1 %v1292_v0  ;;  %vm820_vm10 = vcmask 1041408   ;;  %vm816_vm11 = vcmask 31744  }
  0x17   : > { %1203 = vset.pattern.permute.xlu2 %v1292_v0  ;;  %s1102_s28 = sshll.u32 %s1407_s27, 2  ;;  %s1135_s29 = sshll.u32 %s1407_s27, 4  ;;  %v678_v60 = vshrl.u32 %v677_v56, 7 }
  0x18   : > { %s443_s12 = scalar_lea.vmem %s1532_s0, %s1102_s28  ;;  %s448_s22 = scalar_lea.vmem %s1533_s1, %s1135_s29 }
  0x19   : > { %v466_v1 = vld [vmem:[%s443_s12] sm:$0x7]  ;;  %v468_v3 = vld [vmem:[%s448_s22 + $0x8] sm:$0xff]  ;;  %s453_s17 = scalar_lea.vmem %s1534_s2, %s1135_s29  ;;  %v679_v0 = vadd.s32 8, %v678_v60  ;;  %s457_s21 = scalar_lea.vmem %s1535_s3, %s1102_s28 }
  0x1a   : > { %v467_v2 = vld [vmem:[%s448_s22] sm:$0xff]  ;;  %v490_v4 = vsel %vm488_vm0, %v466_v1, 0  ;;  %v669_v5 = vmul.f32 %v466_v1, %v466_v1  ;;  %v486_v7 = vsel %vm481_vm1, %v468_v3, 0  ;;  %v470_v19 = vld [vmem:[%s453_s17 + $0x8] sm:$0xff]  ;;  %s969_s29 = sshll.u32 %s966_s24, 4  ;;  %s970_s29 = int_to_ptr.hbm [resolvable:$true] %s969_s29 }
  0x1b   : > { %v483_v6 = vsel %vm481_vm1, %v467_v2, 0  ;;  %v469_v8 = vld [vmem:[%s453_s17] sm:$0xff]  ;;  %v507_v9 = vand.u32 4294901760, %v490_v4  ;;  %v517_v11 = vand.u32 4294901760, %v486_v7  ;;  %s1108_s17 = sshll.u32 %s1407_s27, 1  ;;  %s434_s27 = sand.u32 1, %s1274_s14  }
  0x1c   : > { %v509_v10 = vand.u32 4294901760, %v483_v6  ;;  %473 = vperm.xlu0 %1201, %v469_v8   ;;  %v670_v12 = vsel %vm488_vm0, %v669_v5, 0.0  ;;  %v1431_v5 = vcvt.s32.f32 %v679_v0  ;;  %s464_s12 = scalar_lea.vmem %s1536_s4, %s1108_s17  ;;  %vm787_vm0 = vcmask 130048   ;;  %s1101_s28 = sshll.u32 %s434_s27, 5 }
  0x1d   : > { %v542_v13 = vsub.f32 %v490_v4, %v507_v9  ;;  %508 = vmatpush.msra.mxu0 %v507_v9  ;;  %1142 = vmatpush.msra.mxu3 %v507_v9  ;;  %v518_v15 = vsub.f32 %v486_v7, %v517_v11  ;;  %v671_v41 = vrot.slane %v670_v12, 4  ;;  %v1429_v4 = vcvt.s32.f32 %v678_v60  ;;  %s954_s17 = scalar_lea.sflag [#allocation3], %s434_s27  ;;  %s1226_s30 = sshra.s32 %s970_s29, 4  ;;  %s1227_s30 = int_to_ptr.hbm [resolvable:$true] %s1226_s30 }
  0x1e   : > { %v510_v14 = vsub.f32 %v483_v6, %v509_v10  ;;  %659 = vmatpush.msra.mxu1 %v507_v9  ;;  %s1228_s16 = scalar_lea.hbm %s1227_s30, 32  ;;  %p1233_p1 = scmp.lt.s32.totalorder %s1227_s30, %s1542_s10 }
  0x1f   : > { %601 = vmatpush.msrb.mxu3 %v507_v9  ;;  %v543_v16 = vand.u32 4294901760, %v542_v13  ;;  %v519_v18 = vand.u32 4294901760, %v518_v15  ;;  %661 = vmatmul.f32.vlgmr.msra.gmra.mxu1 %v509_v10  ;;  %v672_v48 = vadd.f32 %v671_v41, %v670_v12  ;;  %p1229_p12 = scmp.ne.s32.totalorder %s1227_s30, %s1228_s16  ;;  %p1234_p2 = scmp.lt.s32.totalorder %s1232_s19, %s1228_s16 }
  0x20   : > { %v511_v17 = vand.u32 4294901760, %v510_v14 }
  0x21   : > { %v544_v20 = vsub.f32 %v542_v13, %v543_v16  ;;  %v520_v22 = vsub.f32 %v518_v15, %v519_v18  ;;  %633 = vmatpush.msrb.mxu0 %v543_v16  ;;  %v673_v53 = vrot.slane %v672_v48, 2  ;;  %p1230_p13 = pnand %p1229_p12, %p1390_p4  ;;  %p1235_p3 = por %p1234_p2, %p1233_p1 }
  0x22   : > { %v512_v21 = vsub.f32 %v510_v14, %v511_v17 }
  0x23   : > { %v545_v23 = vand.u32 4294901760, %v544_v20  ;;  %v521_v25 = vand.u32 4294901760, %v520_v22  ;;  %v674_v58 = vadd.f32 %v673_v53, %v672_v48  ;;  %p1231_p0 = pneg %p1230_p13 }
  0x24   : > { %v513_v24 = vand.u32 4294901760, %v512_v21  ;;  %478 = vperm.xlu0 %1201, %v470_v19  }
  0x25   : > { %546 = vmatpush.msra.mxu2 %v545_v23  ;;  %522 = vmatmul.f32.vlgmr.msra.gmra.mxu3 %v521_v25  ;;  %v675_v62 = vrot.slane %v674_v58, 1  ;;  %p1236_p5 = pnand %p1235_p3, %p1231_p0 }
  0x26   : > { %514 = vmatmul.f32.vlgmr.msra.gmra.mxu0 %v513_v24  ;;  %548 = vmatmul.f32.vlgmr.msra.gmra.mxu2 %v509_v10 }
  0x27   : > { %573 = vmatpush.msrb.mxu2 %v542_v13  ;;  %665 = vmatmul.f32.gmra.mxu1 %v517_v11  ;;  %v1427_v2 = vadd.f32 %v675_v62, %v674_v58  ;;  %v1138_v58 = vld [vmem:[%s1537_s5] sm:$0xff] }
  0x2c   : > { %902 = vperm.xlu0 %1201, %v888_v26  }
  0x2d   : > { %605 = vmatmul.f32.vlgmr.msrb.gmra.mxu3 %v511_v17 }
  0x2e   : > { %635 = vmatmul.f32.vlgmr.msrb.gmra.mxu0 %v509_v10  ;;  %552 = vmatmul.f32.gmra.mxu2 %v517_v11 }
  0x35   : > { %611 = vmatmul.f32.gmra.mxu3 %v519_v18 }
  0x36   : > { %639 = vmatmul.f32.gmra.mxu0 %v517_v11  ;;  %576 = vmatmul.f32.vlgmr.msrb.gmra.mxu2 %v510_v14 }
  0x3e   : > { %581 = vmatmul.f32.gmra.mxu2 %v518_v15 }
  0x8e   : > { %v474_v29 = vpop.permute.xlu0 %473 }
  0x96   : > { %v479_v37 = vpop.permute.xlu0 %478 }
  0x9c   : > { %v662_v38 = vpop.f32.mrf.mxu1 }
  0xa3   : > { %v515_v30 = vpop.f32.mrf.mxu0 }
  0xa4   : > { %v516_v32 = vadd.f32 %v515_v30, %v474_v29  ;;  %v666_v51 = vpop.f32.mrf.mxu1 }
  0xa8   : > { %v523_v28 = vpop.f32.mrf.mxu3 }
  0xa9   : > { %v549_v27 = vpop.f32.mrf.mxu2  ;;  %v524_v39 = vadd.f32 %v523_v28, %v479_v37 }
  0xaa   : > { %v550_v36 = vadd.f32 %v549_v27, %v516_v32 }
  0xab   : > { %v636_v35 = vpop.f32.mrf.mxu0 }
  0xb0   : > { %v606_v33 = vpop.f32.mrf.mxu3 }
  0xb1   : > { %v553_v31 = vpop.f32.mrf.mxu2 }
  0xb2   : > { %v554_v42 = vadd.f32 %v553_v31, %v524_v39 }
  0xb3   : > { %v640_v47 = vpop.f32.mrf.mxu0 }
  0xb8   : > { %v612_v45 = vpop.f32.mrf.mxu3 }
  0xb9   : > { %v577_v34 = vpop.f32.mrf.mxu2 }
  0xba   : > { %v578_v40 = vadd.f32 %v577_v34, %v550_v36 }
  0xbc   : > { %v607_v43 = vadd.f32 %v606_v33, %v578_v40 }
  0xbe   : > { %v637_v49 = vadd.f32 %v636_v35, %v607_v43 }
  0xc0   : > { %v663_v54 = vadd.f32 %v662_v38, %v637_v49 }
  0xc1   : > { %v582_v44 = vpop.f32.mrf.mxu2 }
  0xc2   : > { %v583_v46 = vadd.f32 %v582_v44, %v554_v42 }
  0xc4   : > { %v613_v50 = vadd.f32 %v612_v45, %v583_v46 }
  0xc6   : > { %v641_v52 = vadd.f32 %v640_v47, %v613_v50 }
  0xc8   : > { %v667_v55 = vadd.f32 %v666_v51, %v641_v52 }
  0xca   : > { %v682_v57 = vmin.f32 %v663_v54, %v667_v55 }
  0xcc   : > { %v683_v59 = vrot.slane %v682_v57, 4 }
  0xce   : > { %v684_v61 = vmin.f32 %v682_v57, %v683_v59 }
  0xd0   : > { %v685_v63 = vrot.slane %v684_v61, 2 }
  0xd2   : > { %v686_v1 = vmin.f32 %v684_v61, %v685_v63 }
  0xd4   : > { %v687_v3 = vrot.slane %v686_v1, 1 }
  0xd6   : > { %v688_v6 = vmin.f32 %v686_v1, %v687_v3 }
  0xd8   : > { %vm689_vm2 = vcmp.le.f32.partialorder %v663_v54, %v688_v6  ;;  %vm690_vm3 = vcmp.le.f32.partialorder %v667_v55, %v688_v6  ;;  %v702_v7 = vadd.f32 %v688_v6, %v1427_v2 }
  0xd9   : > { %v691_v8 = vsel %vm689_vm2, %v1429_v4, 16.0  ;;  %v692_v9 = vsel %vm690_vm3, %v1431_v5, 16.0 }
  0xda   : > { %v693_v10 = vmin.f32 %v691_v8, %v692_v9  ;;  %v703_v25 = vmax.f32 %v702_v7, 0.0 }
  0xdc   : > { %v694_v11 = vrot.slane %v693_v10, 4  ;;  %v704_v28 = vadd.f32 1e-08, %v703_v25 }
  0xde   : > { %v695_v12 = vmin.f32 %v693_v10, %v694_v11  ;;  %1204 = vrcp.f32 %v704_v28 }
  0xe0   : > { %v696_v13 = vrot.slane %v695_v12, 2 }
  0xe2   : > { %v697_v14 = vmin.f32 %v695_v12, %v696_v13 }
  0xe4   : > { %v698_v15 = vrot.slane %v697_v14, 1  ;;  %v1205_v38 = vpop.eup %1204 }
  0xe6   : > { %v699_v16 = vmin.f32 %v697_v14, %v698_v15 }
  0xe8   : > { %vm700_vm4 = vcmp.eq.f32.partialorder %v1429_v4, %v699_v16  ;;  %vm701_vm5 = vcmp.eq.f32.partialorder %v1431_v5, %v699_v16 }
  0xe9   : > { %v708_v17 = vsel %vm700_vm4, 3e+38, %v663_v54  ;;  %v709_v18 = vsel %vm701_vm5, 3e+38, %v667_v55  ;;  %v706_v43 = vsel %vm700_vm4, %v1205_v38, 0.0  ;;  %v707_v44 = vsel %vm701_vm5, %v1205_v38, 0.0 }
  0xea   : > { %v710_v19 = vmin.f32 %v708_v17, %v709_v18  ;;  %v810_v55 = vld [vmem:[%s464_s12] sm:$0x3]  ;;  %vm847_vm5 = vcmask 1043456   ;;  %s436_s12 = scalar_lea.vmem [#allocation2], %s1101_s28 }
  0xeb   : > { %v822_v57 = vsel %vm820_vm10, %v810_v55, 0 }
  0xec   : > { %v711_v20 = vrot.slane %v710_v19, 4  ;;  %831 = vmatpush.bf16.msra.mxu3 %v822_v57 }
  0xee   : > { %v712_v21 = vmin.f32 %v710_v19, %v711_v20  ;;  %v866_v19 = vld [vmem:[%s1539_s7 + $0x8] sm:$0xff] }
  0xef   : > { %1114 = vmatmul.msk.bf16.vlgmr.msra.gmra.mxu3 %vm816_vm11, %v1138_v58 }
  0xf0   : > { %v713_v22 = vrot.slane %v712_v21, 2 }
  0xf2   : > { %v714_v23 = vmin.f32 %v712_v21, %v713_v22  ;;  %v889_v22 = vld [vmem:[%s1541_s9 + $0x18] sm:$0xff] }
  0xf4   : > { %v715_v24 = vrot.slane %v714_v23, 1 }
  0xf6   : > { %v716_v26 = vmin.f32 %v714_v23, %v715_v24 }
  0xf8   : > { %vm717_vm6 = vcmp.le.f32.partialorder %v708_v17, %v716_v26  ;;  %vm718_vm7 = vcmp.le.f32.partialorder %v709_v18, %v716_v26  ;;  %v730_v27 = vadd.f32 %v716_v26, %v1427_v2 }
  0xf9   : > { %v719_v29 = vsel %vm717_vm6, %v1429_v4, 16.0  ;;  %v720_v30 = vsel %vm718_vm7, %v1431_v5, 16.0  ;;  %vm843_vm6 = vcmask 64512  }
  0xfa   : > { %v721_v31 = vmin.f32 %v719_v29, %v720_v30  ;;  %v731_v32 = vmax.f32 %v730_v27, 0.0 }
  0xfc   : > { %v722_v33 = vrot.slane %v721_v31, 4  ;;  %v732_v34 = vadd.f32 1e-08, %v731_v32 }
  0xfe   : > { %v723_v35 = vmin.f32 %v721_v31, %v722_v33  ;;  %1206 = vrcp.f32 %v732_v34  ;;  %v1137_v34 = vld [vmem:[%s1538_s6] sm:$0xff] }
 0x100   : > { %v724_v36 = vrot.slane %v723_v35, 2 }
 0x102   : > { %v725_v37 = vmin.f32 %v723_v35, %v724_v36 }
 0x104   : > { %v1207_v39 = vpop.eup %1206  ;;  %v726_v40 = vrot.slane %v725_v37, 1 }
 0x105   : > { %v738_v41 = vadd.f32 %v1207_v39, %v1205_v38 }
 0x106   : > { %v727_v42 = vmin.f32 %v725_v37, %v726_v40 }
 0x108   : > { %vm728_vm8 = vcmp.eq.f32.partialorder %v1429_v4, %v727_v42  ;;  %vm729_vm9 = vcmp.eq.f32.partialorder %v1431_v5, %v727_v42 }
 0x109   : > { %v734_v45 = vsel %vm728_vm8, %v1207_v39, 0.0  ;;  %v735_v46 = vsel %vm729_vm9, %v1207_v39, 0.0  ;;  %v739_v47 = vsel %vm728_vm8, 3e+38, %v708_v17  ;;  %v740_v48 = vsel %vm729_vm9, 3e+38, %v709_v18 }
 0x10a   : > { %v737_v49 = vadd.f32 %v735_v46, %v707_v44  ;;  %v741_v50 = vmin.f32 %v739_v47, %v740_v48  ;;  %v736_v51 = vadd.f32 %v734_v45, %v706_v43  ;;  %v785_v18 = vld [vmem:[%s457_s21] sm:$0xf]  ;;  %v887_v46 = vld [vmem:[%s1541_s9 + $0x8] sm:$0xff]  ;;  %s967_s21 = sshll.u32 %s436_s12, 4  ;;  %s968_s21 = int_to_ptr.vmem [resolvable:$true] %s967_s21 }
 0x10b   : > { %v886_v39 = vld [vmem:[%s1541_s9] sm:$0xff] }
 0x10c   : > { %v742_v52 = vrot.slane %v741_v50, 4  ;;  %892 = vperm.xlu2 %1203, %v886_v39  }
 0x10e   : > { %v743_v53 = vmin.f32 %v741_v50, %v742_v52  ;;  %v1140_v52 = vld [vmem:[%s1540_s8 + $0x8] sm:$0xff] }
 0x110   : > { %v744_v54 = vrot.slane %v743_v53, 2 }
 0x112   : > { %v745_v56 = vmin.f32 %v743_v53, %v744_v54 }
 0x114   : > { %v746_v59 = vrot.slane %v745_v56, 1  ;;  %897 = vperm.xlu2 %1203, %v887_v46  }
 0x116   : > { %v747_v60 = vmin.f32 %v745_v56, %v746_v59 }
 0x118   : > { %vm748_vm12 = vcmp.le.f32.partialorder %v739_v47, %v747_v60  ;;  %vm749_vm13 = vcmp.le.f32.partialorder %v740_v48, %v747_v60  ;;  %v761_v61 = vadd.f32 %v747_v60, %v1427_v2 }
 0x119   : > { %v750_v62 = vsel %vm748_vm12, %v1429_v4, 16.0  ;;  %v751_v63 = vsel %vm749_vm13, %v1431_v5, 16.0 }
 0x11a   : > { %v752_v0 = vmin.f32 %v750_v62, %v751_v63  ;;  %v762_v1 = vmax.f32 %v761_v61, 0.0  ;;  %v903_v61 = vpop.permute.xlu0 %902 }
 0x11c   : > { %v753_v3 = vrot.slane %v752_v0, 4  ;;  %v763_v6 = vadd.f32 1e-08, %v762_v1 }
 0x11e   : > { %v754_v7 = vmin.f32 %v752_v0, %v753_v3  ;;  %1208 = vrcp.f32 %v763_v6 }
 0x120   : > { %v755_v8 = vrot.slane %v754_v7, 2 }
 0x122   : > { %v756_v9 = vmin.f32 %v754_v7, %v755_v8 }
 0x124   : > { %v1209_v10 = vpop.eup %1208  ;;  %v757_v11 = vrot.slane %v756_v9, 1 }
 0x125   : > { %v769_v12 = vadd.f32 %v1209_v10, %v738_v41 }
 0x126   : > { %v758_v13 = vmin.f32 %v756_v9, %v757_v11 }
 0x127   : > { %1210 = vrcp.f32 %v769_v12  ;;  %v781_v25 = vand.u32 2147483648, %v769_v12  ;;  %vm775_vm2 = vweird.f32 %v769_v12  ;;  %v779_v26 = vand.u32 2147483647, %v769_v12 }
 0x128   : > { %vm759_vm14 = vcmp.eq.f32.partialorder %v1429_v4, %v758_v13  ;;  %vm760_vm15 = vcmp.eq.f32.partialorder %v1431_v5, %v758_v13  ;;  %v865_v4 = vld [vmem:[%s1539_s7] sm:$0xff] }
 0x129   : > { %v765_v2 = vsel %vm759_vm14, %v1209_v10, 0.0  ;;  %v766_v14 = vsel %vm760_vm15, %v1209_v10, 0.0  ;;  %869 = vperm.xlu1 %1202, %v865_v4   ;;  %v782_v28 = vor.u32 1.1754944e-38, %v781_v25  ;;  %vm780_vm4 = vcmp.eq.f32.partialorder %v779_v26, 8.507059e+37 }
 0x12a   : > { %v767_v15 = vadd.f32 %v765_v2, %v736_v51  ;;  %v768_v16 = vadd.f32 %v766_v14, %v737_v49  ;;  %v1139_v51 = vld [vmem:[%s1540_s8] sm:$0xff] }
 0x12c   : > { %v786_v17 = vpack.c.bf16 %v768_v16, %v767_v15 }
 0x12d   : > { %v1211_v5 = vpop.eup %1210 }
 0x12e   : > { %798 = vmatpush.bf16.msra.mxu2 %v786_v17  ;;  %v771_v20 = vmul.f32 %v1211_v5, %v769_v12  ;;  %vm776_vm1 = vweird.f32 %v1211_v5 }
 0x12f   : > { %vm777_vm3 = vmor %vm775_vm2, %vm776_vm1 }
 0x130   : > { %v772_v21 = vsub.f32 1.0, %v771_v20 }
 0x131   : > { %1109 = vmatmul.msk.bf16.vlgmr.msra.gmra.mxu2 %vm787_vm0, %v785_v18  ;;  %874 = vperm.xlu1 %1202, %v866_v19  }
 0x132   : > { %v773_v23 = vmul.f32 %v1211_v5, %v772_v21 }
 0x134   : > { %v774_v24 = vadd.f32 %v1211_v5, %v773_v23 }
 0x136   : > { %v778_v27 = vsel %vm777_vm3, %v1211_v5, %v774_v24 }
 0x137   : > { %v783_v29 = vsel %vm780_vm4, %v782_v28, %v778_v27 }
 0x139   : > { %907 = vperm.xlu1 %1202, %v889_v22  }
 0x166   : > { %v893_v53 = vpop.permute.xlu2 %892 }
 0x16e   : > { %v898_v57 = vpop.permute.xlu2 %897 }
 0x172   : > { %v833_v36 = vpop.f32.mrf.mxu3 }
 0x17a   : > { %v835_v41 = vpop.f32.mrf.mxu3 }
 0x19b   : > { %v870_v37 = vpop.permute.xlu1 %869 }
 0x1a3   : > { %v875_v45 = vpop.permute.xlu1 %874 }
 0x1ab   : > { %v908_v1 = vpop.permute.xlu1 %907 }
 0x1b4   : > { %v800_v30 = vpop.f32.mrf.mxu2 }
 0x1b5   : > { %v804_v31 = vmul.f32 %v800_v30, %v783_v29 }
 0x1b7   : > { %v807_v32 = vpack.c.bf16 %v804_v31, %v804_v31 }
 0x1b9   : > { %v849_v33 = vsel %vm847_vm5, %v807_v32, 0 }
 0x1ba   : > { %858 = vmatpush.bf16.msra.mxu0 %v849_v33 }
 0x1bc   : > { %v802_v35 = vpop.f32.mrf.mxu2 }
 0x1bd   : > { %1119 = vmatmul.msk.bf16.vlgmr.msra.gmra.mxu0 %vm843_vm6, %v1137_v34 }
 0x23a   : > { %v860_v38 = vpop.f32.mrf.mxu0 }
 0x23b   : > { %v861_v40 = vadd.f32 %v860_v38, %v833_v36 }
 0x23d   : > { %v877_v43 = vadd.f32 %v870_v37, %v861_v40 }
 0x23f   : > { %v879_v48 = vmax.f32 %v877_v43, 0.0 }
 0x242   : > { %v862_v42 = vpop.f32.mrf.mxu0 }
 0x243   : > { %v863_v44 = vadd.f32 %v862_v42, %v835_v41 }
 0x245   : > { %v878_v47 = vadd.f32 %v875_v45, %v863_v44 }
 0x247   : > { %v880_v49 = vmax.f32 %v878_v47, 0.0 }
 0x249   : > { %v885_v50 = vpack.c.bf16 %v880_v49, %v879_v48 }
 0x24b   : > { %933 = vmatpush.bf16.msrb.mxu1 %v885_v50 }
 0x24e   : > { %1128 = vmatmul.msk.bf16.vlgmr.msrb.gmra.mxu1 %vm787_vm0, %v1139_v51 }
 0x25e   : > { %1129 = vmatmul.msk.bf16.gmra.mxu1 %vm787_vm0, %v1140_v52 }
 0x2cb   : > { %v935_v54 = vpop.f32.mrf.mxu1 }
 0x2cc   : > { %v936_v55 = vadd.f32 %v935_v54, %v893_v53 }
 0x2ce   : > { %v945_v56 = vmax.f32 %v936_v55, 0.0 }
 0x2d0   : > { %949 = vst [vmem:[%s436_s12] sm:$0xff] %v945_v56 }
 0x2d3   : > { %v937_v58 = vpop.f32.mrf.mxu1 }
 0x2d4   : > { %v938_v59 = vadd.f32 %v937_v58, %v898_v57 }
 0x2d6   : > { %v946_v60 = vmax.f32 %v938_v59, 0.0 }
 0x2d8   : > { %950 = vst [vmem:[%s436_s12 + $0x8] sm:$0xff] %v946_v60 }
 0x2db   : > { %v940_v62 = vpop.f32.mrf.mxu1 }
 0x2dc   : > { %v941_v63 = vadd.f32 %v940_v62, %v903_v61 }
 0x2de   : > { %v947_v0 = vmax.f32 %v941_v63, 0.0 }
 0x2e0   : > { %951 = vst [vmem:[%s436_s12 + $0x10] sm:$0xff] %v947_v0 }
 0x2e3   : > { %v942_v3 = vpop.f32.mrf.mxu1 }
 0x2e4   : > { %v943_v6 = vadd.f32 %v942_v3, %v908_v1 }
 0x2e6   : > { %v948_v7 = vmax.f32 %v943_v6, 0.0 }
 0x2e8   : > { %952 = vst [vmem:[%s436_s12 + $0x18] sm:$0xff] %v948_v7 }
 0x2e9   : > { %1239 = shalt.err (!%p1236_p5)
}
 0x2ea   : > { %s1293_s27 = smov 128   ;;  %s1294_s12 = smov 8  }
 0x2eb   : > { %1143 = dma.vmem_to_hbm [thread:$0]  (%p1390_p4), %s968_s21, 512, %s970_s29, %s954_s17, %s1293_s27, %s1293_s27, %s1294_s12  }
 0x2ec PF: > { %p1149_p6 = scmp.ge.s32.totalorder %s1290_s18, 2  ;;  %s984_s24 = sand.u32 1, %s1270_s13  }
 0x2ed   : > { %s985_s11 = scalar_lea.sflag [#allocation3], %s984_s24 }
 0x2ee   : > { %p1146_p7 = pnand %p1149_p6, %p1397_p8 }
 0x2f0   : > { %p1147_p9 = pneg %p1146_p7 }
 0x2f2   : > { %1265 = dma.done.wait (%p1147_p9), %s985_s11, 512  }
 0x2f3   : > { %1267 = vsyncadd (%p1147_p9), %s985_s11, 4294966784  ;;  %s23_s18 = sadd.s32 1, %s1290_s18   ;;  %s1549_s16 = sld [smem:[#allocation5_spill]] }
 0x2f4   : > { %p20_p10 = scmp.ge.s32.totalorder %s23_s18, 4   ;;  %s1550_s17 = sld [smem:[#allocation6_spill]] }
 0x2f5   : > { %s1551_s13 = smov %s1274_s14  ;;  %s1552_s14 = smov %s1278_s15 }
 0x2f6   : > { %s1553_s15 = smov %s1403_s26  ;;  %22 = sbr.rel (!%p20_p10) target bundleno = 4 (0x4), region = 107 }
 0x2fb   :  { %991 = vsyncpa [#allocation3], 1 }
 0x2fc   :  { %993 = vsyncpa [#allocation3 + $0x1], 1 }

</bundles_post_ra>
